<compile_context>
chip_gen: v7x
topology: tpu7x:2x2x1
jax: 0.10.0
libtpu: 0.0.40
codegen_flags: <defaults>
</compile_context>

<pallas_src>
import jax
import jax.numpy as jnp
from jax.experimental import pallas as pl
from jax.experimental.pallas import tpu as pltpu


def _linear_kernel(w_ref, b_ref, x_ref, o_ref):
    # w_ref: (1, 1) in SMEM  -- nn.Linear weight (out_features, in_features)
    # b_ref: (1,)   in SMEM  -- nn.Linear bias
    # x_ref: (tr, c) in VMEM -- lane-dense input tile
    # o_ref: (tr, c) in VMEM -- lane-dense output tile
    w = w_ref[0, 0]
    b = b_ref[0]
    # Affine elementwise op on the VPU; compute in the promoted dtype, cast on
    # store so bf16 inputs with f32 params remain correct.
    o_ref[...] = (x_ref[...] * w + b).astype(o_ref.dtype)


def _round_up(x, m):
    return ((x + m - 1) // m) * m


_TARGET_TILE_BYTES = 4 << 20  # ~4 MiB per pipeline buffer


def _linear_forward_impl(x, weight, bias):
    """Pallas equivalent of nn.Linear(1, 1).forward on input x of shape (..., 1)."""
    assert x.shape[-1] == 1 and weight.shape == (1, 1) and bias.shape == (1,)
    orig_shape = x.shape
    n = x.size  # elementwise op -> layout is free
    itemsize = jnp.dtype(x.dtype).itemsize
    sub = max(8, 32 // itemsize)  # sublane packing: f32 -> 8, bf16 -> 16, int8 -> 32

    # Lane width: largest multiple of 128 that divides n (so no padding / no
    # trim is needed); otherwise fall back to 128 and pad only the last row.
    c = 128
    for cand in (1024, 512, 256, 128):
        if n >= cand and n % cand == 0:
            c = cand
            break

    rows = pl.cdiv(n, c)
    if rows * c == n:
        # Common large-batch case: pure view, zero extra HBM traffic.
        x_slab = jnp.ravel(x).reshape(rows, c)
        padded = False
    else:
        # Ragged tail: pad only to rows*c (rounded to the sublane packing);
        # this is < sub*c extra elements, negligible vs. the payload.
        rows = _round_up(rows, sub)
        x_slab = jnp.pad(jnp.ravel(x), (0, rows * c - n)).reshape(rows, c)
        padded = True

    # Tile rows: ~4 MiB per buffer, multiple of the sublane packing, but never
    # larger than needed for this input.
    tr = max(sub, (_TARGET_TILE_BYTES // (c * itemsize)) // sub * sub)
    tr = min(tr, _round_up(rows, sub))
    grid = (pl.cdiv(rows, tr),)  # ragged final block is masked by Pallas

    y_slab = pl.pallas_call(
        _linear_kernel,
        out_shape=jax.ShapeDtypeStruct((rows, c), x.dtype),
        grid_spec=pltpu.PrefetchScalarGridSpec(
            num_scalar_prefetch=0,
            grid=grid,
            in_specs=[
                pl.BlockSpec(memory_space=pltpu.MemorySpace.SMEM),  # weight (1,1)
                pl.BlockSpec(memory_space=pltpu.MemorySpace.SMEM),  # bias   (1,)
                pl.BlockSpec((tr, c), lambda i: (i, 0)),            # x tile
            ],
            out_specs=pl.BlockSpec((tr, c), lambda i: (i, 0)),      # y tile
        ),
        compiler_params=pltpu.CompilerParams(
            dimension_semantics=("parallel",),
            vmem_limit_bytes=48 << 20,  # < v7x's 64 MiB physical VMEM
        ),
    )(weight, bias, x_slab)

    if padded:
        return y_slab.reshape(-1)[:n].reshape(orig_shape)
    return y_slab.reshape(orig_shape)


# Jitted entry point (removes per-op dispatch overhead around pad/pallas/reshape).
linear_forward = jax.jit(_linear_forward_impl)


if __name__ == "__main__":
    key = jax.random.PRNGKey(0)
    kx, kw, kb, kx2 = jax.random.split(key, 4)

    # Deterministic parameter init (mimics nn.Linear(1,1) U(-1, 1) bound, fan_in=1).
    weight = jax.random.uniform(kw, (1, 1), jnp.float32, minval=-1.0, maxval=1.0)
    bias = jax.random.uniform(kb, (1,), jnp.float32, minval=-1.0, maxval=1.0)

    # Small input consistent with the forward: (batch, in_features=1).
    x = jax.random.normal(kx, (8, 1), jnp.float32)          # exercises padded path
    x2 = jax.random.normal(kx2, (2048, 1), jnp.float32)     # exercises no-pad view path

    y = jax.block_until_ready(linear_forward(x, weight, bias))
    y2 = jax.block_until_ready(linear_forward(x2, weight, bias))

    # Reference check (plain JAX), matching PyTorch semantics y = x @ W^T + b.
    y_ref = x @ weight.T + bias
    y2_ref = x2 @ weight.T + bias
    assert y.shape == (8, 1) and y2.shape == (2048, 1)
    assert jnp.allclose(y, y_ref, atol=1e-6), "mismatch vs reference (padded path)"
    assert jnp.allclose(y2, y2_ref, atol=1e-6), "mismatch vs reference (view path)"

    print("KERNEL_OK")
</pallas_src>

<mosaic_0001>
module attributes {stable_mosaic.version = 11 : i64} {
  func.func @_linear_kernel(%arg0: i32, %arg1: memref<1x1xf32, #tpu.memory_space<smem>>, %arg2: memref<1xf32, #tpu.memory_space<smem>>, %arg3: memref<8x128xf32, #tpu.memory_space<vmem>>, %arg4: memref<8x128xf32, #tpu.memory_space<vmem>>) attributes {dimension_semantics = [#tpu.dimension_semantics<parallel>], iteration_bounds = array<i64: 1>, scalar_prefetch = 0 : i64, scratch_operands = 0 : i64, tpu.core_type = #tpu.core_type<tc>, window_params = [{transform_indices = @transform_0, window_bounds = array<i64: 1, 1>}, {transform_indices = @transform_1, window_bounds = array<i64: 1>}, {transform_indices = @transform_2, window_bounds = array<i64: 8, 128>}, {transform_indices = @transform_3, window_bounds = array<i64: 8, 128>}]} {
    %c0 = arith.constant 0 : index
    %c0_0 = arith.constant 0 : index
    %0 = memref.load %arg1[%c0, %c0_0] : memref<1x1xf32, #tpu.memory_space<smem>>
    %c0_1 = arith.constant 0 : index
    %1 = memref.load %arg2[%c0_1] : memref<1xf32, #tpu.memory_space<smem>>
    %c0_2 = arith.constant 0 : index
    %c0_3 = arith.constant 0 : index
    %2 = vector.load %arg3[%c0_2, %c0_3] : memref<8x128xf32, #tpu.memory_space<vmem>>, vector<8x128xf32>
    %3 = vector.broadcast %0 : f32 to vector<8x128xf32>
    %4 = arith.mulf %2, %3 : vector<8x128xf32>
    %5 = vector.broadcast %1 : f32 to vector<8x128xf32>
    %6 = arith.addf %4, %5 : vector<8x128xf32>
    %c0_4 = arith.constant 0 : index
    %c0_5 = arith.constant 0 : index
    %7 = vector.load %arg4[%c0_4, %c0_5] : memref<8x128xf32, #tpu.memory_space<vmem>>, vector<8x128xf32>
    tpu.vector_store %arg4[%c0_4, %c0_5], %6 {strides = array<i32>} : memref<8x128xf32, #tpu.memory_space<vmem>>, vector<8x128xf32>,
    return
  }
  func.func @transform_0(%arg0: i32) -> (i32, i32) {
    %c0_i32 = arith.constant 0 : i32
    %c0_i32_0 = arith.constant 0 : i32
    %c0_i32_1 = arith.constant 0 : i32
    return %c0_i32, %c0_i32_0 : i32, i32
  }
  func.func @transform_1(%arg0: i32) -> i32 {
    %c0_i32 = arith.constant 0 : i32
    %c0_i32_0 = arith.constant 0 : i32
    return %c0_i32 : i32
  }
  func.func @transform_2(%arg0: i32) -> (i32, i32) {
    %c0_i32 = arith.constant 0 : i32
    %c0_i32_0 = arith.constant 0 : i32
    return %arg0, %c0_i32 : i32, i32
  }
  func.func @transform_3(%arg0: i32) -> (i32, i32) {
    %c0_i32 = arith.constant 0 : i32
    %c0_i32_0 = arith.constant 0 : i32
    return %arg0, %c0_i32 : i32, i32
  }
}

</mosaic_0001>

<bundles_post_ra>
// kernel: _linear_forward_impl.1
= control target key start
LH: loop header
LB: loop body
LE: loop exit
PB: predicated region body
PF: predicated region fallthrough
CT: control target
= control target key end

     0   :  { %s60_s0 = inlined_call_operand.<no memory space> [shape: f32[1,1], index: 0, kind: input, shape index: {}]   ;;  %s61_s1 = inlined_call_operand.<no memory space> [shape: f32[1], index: 1, kind: input, shape index: {}]   ;;  %s62_s2 = inlined_call_operand.vmem [shape: f32[8,128], index: 2, kind: input, shape index: {}]   ;;  %s63_s3 = inlined_call_operand.vmem [shape: f32[8,128], index: 3, kind: output, shape index: {}]  }
   0x1   :  { %v18_v0 = vld [vmem:[%s62_s2] sm:$0xff]  ;;  %v19_v1 = vstv %s60_s0  ;;  %v21_v2 = vstv %s61_s1 }
   0x2   :  { %v20_v3 = vmul.f32 %v19_v1, %v18_v0 }
   0x4   :  { %v22_v4 = vadd.f32 %v21_v2, %v20_v3 }
   0x6   :  { %23 = vst [vmem:[%s63_s3] sm:$0xff] %v22_v4 }

</bundles_post_ra>
